<compile_context>
chip_gen: v6e
topology: v6e:2x2x1
jax: 0.10.0
libtpu: 0.0.40
codegen_flags: <defaults>
</compile_context>

<pallas_src>
import jax
import jax.numpy as jnp
from jax.experimental import pallas as pl
from jax.experimental.pallas import tpu as pltpu


def _make_se_kernel(channels_last):
    """Build the fused SE kernel for one of the two block layouts."""

    def se_block_kernel(x_ref, w1t_ref, b1_ref, w2t_ref, b2_ref, o_ref):
        # x_ref:   (Bt, C, HW) or (Bt, HW, C)   stream dtype (f32 or bf16)
        # w1t_ref: (C, Cr) f32   linear1 weight, pre-transposed (in, out)
        # b1_ref:  (1, Cr) f32
        # w2t_ref: (Cr, C) f32   linear2 weight, pre-transposed (in, out)
        # b2_ref:  (1, C)  f32
        # o_ref:   same block shape as x_ref, output dtype (f32 or bf16)
        x = x_ref[...]

        # AdaptiveAvgPool2d((1,1)) + Flatten -> (Bt, C); accumulate in f32.
        # The cast fuses per-vreg into the reduce -- no f32 copy of the tile.
        if channels_last:
            hw = x.shape[1]
            pooled = jnp.sum(x.astype(jnp.float32), axis=1) * (1.0 / hw)   # (Bt, C)
        else:
            hw = x.shape[-1]
            pooled = jnp.sum(x.astype(jnp.float32), axis=-1) * (1.0 / hw)  # (Bt, C)

        # Excitation MLP in f32 (tiny; MXU/EUP, not the bottleneck).
        h = jnp.dot(pooled, w1t_ref[...],
                    preferred_element_type=jnp.float32) + b1_ref[...]      # (Bt, Cr)
        h = jnp.maximum(h, 0.0)
        s = jnp.dot(h, w2t_ref[...],
                    preferred_element_type=jnp.float32) + b2_ref[...]      # (Bt, C)
        s = jax.nn.sigmoid(s)

        # Per-channel scale, applied directly in the stream dtype (no shared
        # f32 temp of the whole tile), cast on store to the output dtype.
        s = s.astype(x.dtype)
        if channels_last:
            o_ref[...] = (x * s[:, None, :]).astype(o_ref.dtype)
        else:
            o_ref[...] = (x * s[:, :, None]).astype(o_ref.dtype)

    return se_block_kernel


def _choose_batch_tile(B, per_elem_bytes, *,
                       budget_bytes=2 * 1024 * 1024,
                       min_tile_bytes=1 * 1024 * 1024,
                       target_steps=8):
    """Batch tile Bt (need not divide B): aim for ~target_steps grid steps,
    keep tiles >= ~1 MiB (amortize per-step overhead), cap at ~2 MiB
    (double-buffered in+out must fit v7x's 64 MiB VMEM), prefer an even total
    step count so v7x's two TensorCores get equal work."""
    bt_budget = max(1, budget_bytes // per_elem_bytes)   # hard VMEM cap
    bt_min = max(1, min_tile_bytes // per_elem_bytes)    # amortize step overhead
    bt = max(1, B // target_steps)                       # as many steps as B allows
    bt = max(bt, bt_min)                                 # ...but keep tiles >= ~1 MiB
    bt = min(bt, bt_budget, B)
    steps = pl.cdiv(B, bt)
    if steps > 1 and steps % 2 == 1:
        bt_up = pl.cdiv(B, steps - 1)                    # one tile-size up -> even steps
        if bt_up <= min(bt_budget, B) and pl.cdiv(B, bt_up) % 2 == 0:
            bt = bt_up
    return bt


def se_block_forward(x_nchw, w1, b1, w2, b2, *, out_dtype=None, channels_last=None):
    """SEBlock forward.

    x_nchw: (B, C, H, W); w1: (Cr, C); b1: (Cr,); w2: (C, Cr); b2: (C,).
    x streams through the kernel in its native dtype (no wrapper-side cast
    pass). `out_dtype` defaults to x's dtype; pass jnp.bfloat16 for the
    f32-in/bf16-out streaming path (6 B/elem of HBM traffic).
    """
    B, C, H, W = x_nchw.shape
    Cr = w1.shape[0]
    HW = H * W
    in_dtype = x_nchw.dtype
    out_dtype = in_dtype if out_dtype is None else jnp.dtype(out_dtype)

    # Lane-dense layout choice: put C on the lane axis when it is a multiple
    # of 128 and HW is not (unmasked full-width stores regardless of HW).
    if channels_last is None:
        channels_last = (C % 128 == 0) and (HW % 128 != 0)

    x = x_nchw.reshape(B, C, HW)                      # free (contiguous) reshape
    if channels_last:
        # TODO(synk): this transpose is an extra HBM pass; in a real network the
        # producer/consumer should keep the activation channel-last (NHWC).
        x = jnp.transpose(x, (0, 2, 1))               # (B, HW, C)

    w1t = jnp.transpose(w1).astype(jnp.float32)       # (C, Cr)
    w2t = jnp.transpose(w2).astype(jnp.float32)       # (Cr, C)
    b1r = b1.reshape(1, Cr).astype(jnp.float32)
    b2r = b2.reshape(1, C).astype(jnp.float32)

    in_item = jnp.dtype(in_dtype).itemsize
    out_item = jnp.dtype(out_dtype).itemsize
    per_elem_bytes = C * HW * in_item
    Bt = _choose_batch_tile(B, per_elem_bytes)
    n_steps = pl.cdiv(B, Bt)
    # TODO(synk): if one (C, HW) slab ever exceeds the per-tile VMEM budget,
    # switch to a two-phase pool-then-scale structure over an 'arbitrary' HW
    # grid axis instead of keeping the whole slab resident per step.

    if channels_last:
        x_block = (Bt, HW, C)
    else:
        x_block = (Bt, C, HW)

    # Advisory cost: this is a long, memory-bound op (2 streaming passes of x).
    cost = pl.CostEstimate(
        flops=2 * B * C * HW + 4 * B * C * Cr,
        transcendentals=2 * B * C,
        bytes_accessed=B * C * HW * (in_item + out_item)
                       + 4 * (2 * C * Cr + C + Cr),
    )

    out = pl.pallas_call(
        _make_se_kernel(channels_last),
        out_shape=jax.ShapeDtypeStruct(x.shape, out_dtype),
        grid_spec=pltpu.PrefetchScalarGridSpec(
            num_scalar_prefetch=0,
            grid=(n_steps,),
            in_specs=[
                pl.BlockSpec(x_block, lambda b: (b, 0, 0)),  # x batch tile
                pl.BlockSpec((C, Cr), lambda b: (0, 0)),     # w1^T (resident)
                pl.BlockSpec((1, Cr), lambda b: (0, 0)),     # b1
                pl.BlockSpec((Cr, C), lambda b: (0, 0)),     # w2^T (resident)
                pl.BlockSpec((1, C), lambda b: (0, 0)),      # b2
            ],
            out_specs=pl.BlockSpec(x_block, lambda b: (b, 0, 0)),
        ),
        compiler_params=pltpu.CompilerParams(
            dimension_semantics=("parallel",),
            # ~2 MiB tiles, double-buffered in+out (<~8 MiB) + tiny weights;
            # 48 MiB is safe on v7x (64 MiB physical) and lifts v5e's 16 MiB
            # scoped default.
            vmem_limit_bytes=48 * 1024 * 1024,
        ),
        cost_estimate=cost,
    )(x, w1t, b1r, w2t, b2r)

    if channels_last:
        out = jnp.transpose(out, (0, 2, 1))
    return out.reshape(B, C, H, W)


def _reference(x, w1, b1, w2, b2):
    # Pure-JAX reference mirroring the PyTorch forward.
    pooled = jnp.mean(x, axis=(2, 3))                      # (B, C)
    h = jnp.maximum(pooled @ w1.T + b1, 0.0)               # (B, Cr)
    s = jax.nn.sigmoid(h @ w2.T + b2)                      # (B, C)
    return s[:, :, None, None] * x


def _make_params(key, C, r):
    Cr = max(1, C // r)
    kw1, kb1, kw2, kb2 = jax.random.split(key, 4)
    # Deterministic init mimicking nn.Linear default (uniform +/- 1/sqrt(fan_in)).
    bound1 = 1.0 / jnp.sqrt(jnp.float32(C))
    w1 = jax.random.uniform(kw1, (Cr, C), jnp.float32, -bound1, bound1)
    b1 = jax.random.uniform(kb1, (Cr,), jnp.float32, -bound1, bound1)
    bound2 = 1.0 / jnp.sqrt(jnp.float32(Cr))
    w2 = jax.random.uniform(kw2, (C, Cr), jnp.float32, -bound2, bound2)
    b2 = jax.random.uniform(kb2, (C,), jnp.float32, -bound2, bound2)
    return w1, b1, w2, b2


if __name__ == "__main__":
    key = jax.random.PRNGKey(0)

    # --- Test 1: SEBlock(channels=32, r=16), f32 in / f32 out (default) ------
    k1, k2, key = jax.random.split(key, 3)
    B, C, H, W = 2, 32, 16, 16
    w1, b1, w2, b2 = _make_params(k1, C, 16)
    x = jax.random.normal(k2, (B, C, H, W), jnp.float32)
    ref = _reference(x, w1, b1, w2, b2)

    out = jax.block_until_ready(se_block_forward(x, w1, b1, w2, b2))
    assert out.shape == (B, C, H, W) and out.dtype == jnp.float32
    assert jnp.allclose(out, ref, atol=1e-5, rtol=1e-5), "f32 path mismatch"

    # f32-in / bf16-out streaming path (no wrapper-side cast pass).
    out_bf16 = jax.block_until_ready(
        se_block_forward(x, w1, b1, w2, b2, out_dtype=jnp.bfloat16))
    assert out_bf16.dtype == jnp.bfloat16
    assert jnp.allclose(out_bf16.astype(jnp.float32), ref,
                        atol=5e-2, rtol=5e-2), "bf16-out path mismatch"

    # --- Test 2: channel-last (lane-dense) layout: C % 128 == 0, HW = 49 -----
    k1, k2, key = jax.random.split(key, 3)
    B, C, H, W = 4, 128, 7, 7
    w1, b1, w2, b2 = _make_params(k1, C, 16)
    x = jax.random.normal(k2, (B, C, H, W), jnp.float32)
    ref = _reference(x, w1, b1, w2, b2)
    out = jax.block_until_ready(se_block_forward(x, w1, b1, w2, b2))
    assert jnp.allclose(out, ref, atol=1e-4, rtol=1e-4), "channel-last mismatch"

    # --- Test 3: non-divisor batch (ragged last grid step) -------------------
    k1, k2, key = jax.random.split(key, 3)
    B, C, H, W = 5, 100, 32, 32
    w1, b1, w2, b2 = _make_params(k1, C, 16)
    x = jax.random.normal(k2, (B, C, H, W), jnp.float32)
    ref = _reference(x, w1, b1, w2, b2)
    out = jax.block_until_ready(se_block_forward(x, w1, b1, w2, b2))
    assert jnp.allclose(out, ref, atol=1e-4, rtol=1e-4), "ragged-batch mismatch"

    print("KERNEL_OK")
</pallas_src>

<mosaic_0001>
module attributes {stable_mosaic.version = 11 : i64} {
  func.func @se_block_kernel(%arg0: i32, %arg1: memref<2x32x256xf32, #tpu.memory_space<vmem>>, %arg2: memref<32x2xf32, #tpu.memory_space<vmem>>, %arg3: memref<1x2xf32, #tpu.memory_space<vmem>>, %arg4: memref<2x32xf32, #tpu.memory_space<vmem>>, %arg5: memref<1x32xf32, #tpu.memory_space<vmem>>, %arg6: memref<2x32x256xf32, #tpu.memory_space<vmem>>) attributes {dimension_semantics = [#tpu.dimension_semantics<parallel>], iteration_bounds = array<i64: 1>, scalar_prefetch = 0 : i64, scratch_operands = 0 : i64, tpu.core_type = #tpu.core_type<tc>, window_params = [{transform_indices = @transform_0, window_bounds = array<i64: 2, 32, 256>}, {pipeline_mode = #tpu.pipeline_mode<synchronous>, transform_indices = @transform_1, window_bounds = array<i64: 32, 2>}, {pipeline_mode = #tpu.pipeline_mode<synchronous>, transform_indices = @transform_2, window_bounds = array<i64: 1, 2>}, {pipeline_mode = #tpu.pipeline_mode<synchronous>, transform_indices = @transform_3, window_bounds = array<i64: 2, 32>}, {pipeline_mode = #tpu.pipeline_mode<synchronous>, transform_indices = @transform_4, window_bounds = array<i64: 1, 32>}, {transform_indices = @transform_5, window_bounds = array<i64: 2, 32, 256>}]} {
    %c0 = arith.constant 0 : index
    %c0_0 = arith.constant 0 : index
    %c0_1 = arith.constant 0 : index
    %0 = vector.load %arg1[%c0, %c0_0, %c0_1] : memref<2x32x256xf32, #tpu.memory_space<vmem>>, vector<2x32x256xf32>
    %cst = arith.constant dense<0.000000e+00> : vector<2x32xf32>
    %1 = vector.multi_reduction <add>, %0, %cst [2] : vector<2x32x256xf32> to vector<2x32xf32>
    %cst_2 = arith.constant 3.906250e-03 : f32
    %2 = vector.broadcast %cst_2 : f32 to vector<2x32xf32>
    %3 = arith.mulf %1, %2 : vector<2x32xf32>
    %c0_3 = arith.constant 0 : index
    %c0_4 = arith.constant 0 : index
    %4 = vector.load %arg2[%c0_3, %c0_4] : memref<32x2xf32, #tpu.memory_space<vmem>>, vector<32x2xf32>
    %cst_5 = arith.constant dense<0.000000e+00> : vector<2x2xf32>
    %5 = tpu.matmul %3, %4, %cst_5 {dimension_numbers = #tpu.dot_dimension_numbers<[1], [0], [0], [1], [0, 0, 1, 1], [], []>} : vector<2x32xf32>, vector<32x2xf32>, vector<2x2xf32> -> vector<2x2xf32>
    %c0_6 = arith.constant 0 : index
    %c0_7 = arith.constant 0 : index
    %6 = vector.load %arg3[%c0_6, %c0_7] : memref<1x2xf32, #tpu.memory_space<vmem>>, vector<1x2xf32>
    %7 = vector.broadcast %6 : vector<1x2xf32> to vector<2x2xf32>
    %8 = arith.addf %5, %7 : vector<2x2xf32>
    %cst_8 = arith.constant 0.000000e+00 : f32
    %9 = vector.broadcast %cst_8 : f32 to vector<2x2xf32>
    %10 = arith.maximumf %8, %9 : vector<2x2xf32>
    %c0_9 = arith.constant 0 : index
    %c0_10 = arith.constant 0 : index
    %11 = vector.load %arg4[%c0_9, %c0_10] : memref<2x32xf32, #tpu.memory_space<vmem>>, vector<2x32xf32>
    %cst_11 = arith.constant dense<0.000000e+00> : vector<2x32xf32>
    %12 = tpu.matmul %10, %11, %cst_11 {dimension_numbers = #tpu.dot_dimension_numbers<[1], [0], [0], [1], [0, 0, 1, 1], [], []>} : vector<2x2xf32>, vector<2x32xf32>, vector<2x32xf32> -> vector<2x32xf32>
    %c0_12 = arith.constant 0 : index
    %c0_13 = arith.constant 0 : index
    %13 = vector.load %arg5[%c0_12, %c0_13] : memref<1x32xf32, #tpu.memory_space<vmem>>, vector<1x32xf32>
    %14 = vector.broadcast %13 : vector<1x32xf32> to vector<2x32xf32>
    %15 = arith.addf %12, %14 : vector<2x32xf32>
    %16 = arith.negf %15 : vector<2x32xf32>
    %17 = math.exp %16 : vector<2x32xf32>
    %cst_14 = arith.constant 1.000000e+00 : f32
    %18 = vector.broadcast %cst_14 : f32 to vector<2x32xf32>
    %19 = arith.addf %18, %17 : vector<2x32xf32>
    %20 = arith.divf %18, %19 : vector<2x32xf32>
    %21 = vector.shape_cast %20 : vector<2x32xf32> to vector<2x32x1xf32>
    %22 = vector.broadcast %21 : vector<2x32x1xf32> to vector<2x32x256xf32>
    %23 = arith.mulf %0, %22 : vector<2x32x256xf32>
    %c0_15 = arith.constant 0 : index
    %c0_16 = arith.constant 0 : index
    %c0_17 = arith.constant 0 : index
    %24 = vector.load %arg6[%c0_15, %c0_16, %c0_17] : memref<2x32x256xf32, #tpu.memory_space<vmem>>, vector<2x32x256xf32>
    tpu.vector_store %arg6[%c0_15, %c0_16, %c0_17], %23 {strides = array<i32>} : memref<2x32x256xf32, #tpu.memory_space<vmem>>, vector<2x32x256xf32>,
    return
  }
  func.func @transform_0(%arg0: i32) -> (i32, i32, i32) {
    %c0_i32 = arith.constant 0 : i32
    %c0_i32_0 = arith.constant 0 : i32
    %c0_i32_1 = arith.constant 0 : i32
    return %arg0, %c0_i32, %c0_i32_0 : i32, i32, i32
  }
  func.func @transform_1(%arg0: i32) -> (i32, i32) {
    %c0_i32 = arith.constant 0 : i32
    %c0_i32_0 = arith.constant 0 : i32
    %c0_i32_1 = arith.constant 0 : i32
    return %c0_i32, %c0_i32_0 : i32, i32
  }
  func.func @transform_2(%arg0: i32) -> (i32, i32) {
    %c0_i32 = arith.constant 0 : i32
    %c0_i32_0 = arith.constant 0 : i32
    %c0_i32_1 = arith.constant 0 : i32
    return %c0_i32, %c0_i32_0 : i32, i32
  }
  func.func @transform_3(%arg0: i32) -> (i32, i32) {
    %c0_i32 = arith.constant 0 : i32
    %c0_i32_0 = arith.constant 0 : i32
    %c0_i32_1 = arith.constant 0 : i32
    return %c0_i32, %c0_i32_0 : i32, i32
  }
  func.func @transform_4(%arg0: i32) -> (i32, i32) {
    %c0_i32 = arith.constant 0 : i32
    %c0_i32_0 = arith.constant 0 : i32
    %c0_i32_1 = arith.constant 0 : i32
    return %c0_i32, %c0_i32_0 : i32, i32
  }
  func.func @transform_5(%arg0: i32) -> (i32, i32, i32) {
    %c0_i32 = arith.constant 0 : i32
    %c0_i32_0 = arith.constant 0 : i32
    %c0_i32_1 = arith.constant 0 : i32
    return %arg0, %c0_i32, %c0_i32_0 : i32, i32, i32
  }
}

</mosaic_0001>

<bundles_post_ra>
// kernel: tpu_custom_call.1
= control target key start
LH: loop header
LB: loop body
LE: loop exit
PB: predicated region body
PF: predicated region fallthrough
CT: control target
= control target key end

     0   :  { %10 = vsyncpa [#allocation3], 0  ;;  %s627_s0 = inlined_call_operand.hbm [shape: f32[2,32,256], index: 0, kind: input, shape index: {}]   ;;  %s628_s1 = inlined_call_operand.vmem [shape: f32[32,2], index: 1, kind: input, shape index: {}]   ;;  %s629_s2 = inlined_call_operand.vmem [shape: f32[1,2], index: 2, kind: input, shape index: {}]   ;;  %s630_s3 = inlined_call_operand.vmem [shape: f32[2,32], index: 3, kind: input, shape index: {}]   ;;  %s631_s4 = inlined_call_operand.vmem [shape: f32[1,32], index: 4, kind: input, shape index: {}]   ;;  %s632_s5 = inlined_call_operand.hbm [shape: f32[2,32,256], index: 5, kind: output, shape index: {}]  }
   0x1   :  { %11 = vsyncpa [#allocation4], 0  ;;  %s486_s18 = smov [#allocation2]  }
   0x2   :  { %s17_s19 = sshll.u32 %s486_s18, 4  ;;  %s18_s19 = int_to_ptr.vmem [resolvable:$true] %s17_s19 }
   0x3   :  { %s450_s20 = scalar_lea.vmem %s18_s19, 2048  ;;  %p455_p1 = scmp.lt.s32.totalorder %s18_s19, %s18_s19 }
   0x4   :  { %p451_p0 = scmp.ne.s32.totalorder %s18_s19, %s450_s20  ;;  %p456_p2 = scmp.lt.s32.totalorder %s450_s20, %s450_s20 }
   0x6   :  { %p457_p3 = por %p456_p2, %p455_p1 }
   0x8   :  { %p458_p4 = pnand %p457_p3, %p451_p0 }
   0xa   :  { %461 = shalt.err (!%p458_p4)
}
   0xb   :  { %s487_s21 = smov 256   ;;  %s488_s22 = smov 16  }
   0xc   :  { %23 = dma.hbm_to_vmem [thread:$0]  %s627_s0, 2048, %s18_s19, [#allocation3], %s487_s21, %s487_s21, %s488_s22  }
   0xd   :  { %482 = dma.done.wait [#allocation3], 2048  }
   0xe   :  { %483 = vsyncadd [#allocation3], 4294965248  ;;  %v528_v0 = vld [vmem:[#allocation2 + $0x40] sm:$0xff]  ;;  %v530_v1 = vld [vmem:[#allocation2 + $0x48] sm:$0xff]  ;;  %v489_v24 = vmov 0.0   ;;  %vm490_vm0 = vmmov 0   ;;  %v102_v29 = vlaneseq }
   0xf   :  { %v532_v2 = vld [vmem:[#allocation2] sm:$0xff]  ;;  %v63_v3 = vadd.f32 %v530_v1, %v528_v0  ;;  %v536_v4 = vld [vmem:[#allocation2 + $0x8] sm:$0xff]  ;;  %v538_v5 = vld [vmem:[#allocation2 + $0x50] sm:$0xff]  ;;  %416 = vmatprep.subr.mxu0 %v489_v24  ;;  %427 = vmatprep.subr.mxu1 %v489_v24  ;;  %vm113_vm1 = vcmask 130112   ;;  %vm120_vm2 = vcmask 195712   ;;  %vm127_vm3 = vcmask 261312  }
  0x10   :  { %v540_v6 = vld [vmem:[#allocation2 + $0x58] sm:$0xff]  ;;  %v51_v7 = vadd.f32 %v536_v4, %v532_v2  ;;  %v544_v8 = vld [vmem:[#allocation2 + $0x10] sm:$0xff]  ;;  %v552_v12 = vld [vmem:[#allocation2 + $0x60] sm:$0xff]  ;;  %424 = vmatprep.mubr.msk.f32.mxu0 %vm490_vm0, %v489_v24  ;;  %429 = vmatprep.mubr.msk.f32.mxu1 %vm490_vm0, %v489_v24  ;;  %v103_v31 = vand.u32 127, %v102_v29  ;;  %v588_v36 = vshrl.u32 %v102_v29, 7  ;;  %vm148_vm4 = vcmask 1041409  }
  0x11   :  { %v546_v9 = vld [vmem:[#allocation2 + $0x18] sm:$0xff]  ;;  %64 = vadd.xlane.f32.xlu1 %v63_v3  ;;  %v66_v10 = vadd.f32 %v540_v6, %v538_v5  ;;  %v554_v13 = vld [vmem:[#allocation2 + $0x68] sm:$0xff]  ;;  %v556_v14 = vld [vmem:[#allocation2 + $0x20] sm:$0xff]  ;;  %vm150_vm5 = vcmask 261120   ;;  %vm236_vm6 = vcmask 1041408   ;;  %vm232_vm7 = vcmask 15360  }
  0x12   :  { %52 = vadd.xlane.f32.xlu0 %v51_v7  ;;  %v54_v11 = vadd.f32 %v546_v9, %v544_v8  ;;  %v558_v15 = vld [vmem:[#allocation2 + $0x28] sm:$0xff]  ;;  %v69_v16 = vadd.f32 %v554_v13, %v552_v12  ;;  %v564_v18 = vld [vmem:[#allocation2 + $0x70] sm:$0xff]  ;;  %v566_v19 = vld [vmem:[#allocation2 + $0x78] sm:$0xff]  ;;  %v108_v33 = vadd.s32 4294967288, %v103_v31  ;;  %v115_v35 = vadd.s32 4294967280, %v103_v31 }
  0x13   :  { %v57_v17 = vadd.f32 %v558_v15, %v556_v14  ;;  %v568_v20 = vld [vmem:[#allocation2 + $0x30] sm:$0xff]  ;;  %v570_v21 = vld [vmem:[#allocation2 + $0x38] sm:$0xff]  ;;  %v72_v22 = vadd.f32 %v566_v19, %v564_v18  ;;  %v84_v27 = vld [vmem:[%s628_s1 + $0x8] sm:$0xff]  ;;  %v122_v40 = vadd.s32 4294967272, %v103_v31  ;;  %v106_v44 = vsub.s32 %v103_v31, %v588_v36 }
  0x14   :  { %v60_v23 = vadd.f32 %v570_v21, %v568_v20  ;;  %v86_v25 = vld [vmem:[%s628_s1 + $0x18] sm:$0xff]  ;;  %v85_v26 = vld [vmem:[%s628_s1 + $0x10] sm:$0xff]  ;;  %v83_v28 = vld [vmem:[%s628_s1] sm:$0xff]  ;;  %v111_v38 = vsub.s32 %v108_v33, %v588_v36  ;;  %v118_v42 = vsub.s32 %v115_v35, %v588_v36  ;;  %v318_v35 = vsub.s32 0, %v588_v36 }
  0x15   :  { %67 = vadd.xlane.f32.xlu1 %v66_v10  ;;  %417 = vmatpush3.msra.mxu0 %v86_v25  ;;  %v125_v51 = vsub.s32 %v122_v40, %v588_v36 }
  0x16   :  { %55 = vadd.xlane.f32.xlu0 %v54_v11  ;;  %418 = vmatprep.subr.mxu0 %v489_v24 }
  0x17   :  { %419 = vmatpush3.msra.mxu0 %v85_v26 }
  0x18   :  { %420 = vmatprep.subr.mxu0 %v489_v24 }
  0x19   :  { %70 = vadd.xlane.f32.xlu1 %v69_v16  ;;  %421 = vmatpush3.msra.mxu0 %v84_v27 }
  0x1a   :  { %58 = vadd.xlane.f32.xlu0 %v57_v17  ;;  %422 = vmatprep.subr.mxu0 %v489_v24 }
  0x1b   :  { %423 = vmatpush3.msra.mxu0 %v83_v28  ;;  %v405_v28 = vld [vmem:[%s631_s4] ss:$0 sm:$0xff] }
  0x1d   :  { %73 = vadd.xlane.f32.xlu1 %v72_v22  ;;  %v224_v22 = vld [vmem:[%s630_s3] sm:$0x3] }
  0x1e   :  { %61 = vadd.xlane.f32.xlu0 %v60_v23  ;;  %428 = vmatpush3.msk.msra.mxu1 %vm236_vm6, %v224_v22  ;;  %v403_v23 = vld [vmem:[%s629_s2] ss:$0 sm:$0xff]  ;;  %s491_s2 = smov [#allocation5]  }
  0x1f   :  { %s391_s3 = sshll.u32 %s491_s2, 4  ;;  %s392_s3 = int_to_ptr.vmem [resolvable:$true] %s391_s3 }
  0x20   :  { %s462_s4 = scalar_lea.vmem %s392_s3, 2048  ;;  %p467_p6 = scmp.lt.s32.totalorder %s392_s3, %s392_s3 }
  0x21   :  { %p463_p5 = scmp.ne.s32.totalorder %s392_s3, %s462_s4  ;;  %p468_p7 = scmp.lt.s32.totalorder %s462_s4, %s462_s4 }
  0x23   :  { %p469_p8 = por %p468_p7, %p467_p6 }
  0x25   :  { %p470_p9 = pnand %p469_p8, %p463_p5 }
  0x9a   :  { %v65_v30 = vpop.xlane.xlu1 %64 }
  0x9b   :  { %v53_v32 = vpop.xlane.xlu0 %52  ;;  %v79_v45 = vmul.f32 0.00390625, %v65_v30 }
  0x9c   :  { %v75_v48 = vmul.f32 0.00390625, %v53_v32 }
  0x9d   :  { %v132_v55 = vrot.slane %v79_v45, %v106_v44 }
  0x9e   :  { %v68_v34 = vpop.xlane.xlu1 %67  ;;  %v107_v59 = vrot.slane %v75_v48, %v106_v44 }
  0x9f   :  { %v56_v37 = vpop.xlane.xlu0 %55  ;;  %v80_v39 = vmul.f32 0.00390625, %v68_v34 }
  0xa0   :  { %v76_v41 = vmul.f32 0.00390625, %v56_v37 }
  0xa1   :  { %v136_v50 = vrot.slane %v80_v39, %v111_v38  ;;  %v337_v39 = vsub.s32 1, %v588_v36 }
  0xa2   :  { %v71_v43 = vpop.xlane.xlu1 %70  ;;  %v112_v52 = vrot.slane %v76_v41, %v111_v38 }
  0xa3   :  { %v81_v46 = vmul.f32 0.00390625, %v71_v43  ;;  %v59_v47 = vpop.xlane.xlu0 %58  ;;  %v137_v61 = vsel %vm113_vm1, %v136_v50, %v132_v55 }
  0xa4   :  { %v77_v49 = vmul.f32 0.00390625, %v59_v47  ;;  %v114_v63 = vsel %vm113_vm1, %v112_v52, %v107_v59 }
  0xa5   :  { %v141_v53 = vrot.slane %v81_v46, %v118_v42 }
  0xa6   :  { %v74_v54 = vpop.xlane.xlu1 %73  ;;  %v119_v56 = vrot.slane %v77_v49, %v118_v42 }
  0xa7   :  { %v82_v57 = vmul.f32 0.00390625, %v74_v54  ;;  %v62_v58 = vpop.xlane.xlu0 %61  ;;  %v142_v3 = vsel %vm120_vm2, %v141_v53, %v137_v61 }
  0xa8   :  { %v78_v60 = vmul.f32 0.00390625, %v62_v58  ;;  %v121_v10 = vsel %vm120_vm2, %v119_v56, %v114_v63 }
  0xa9   :  { %v146_v62 = vrot.slane %v82_v57, %v125_v51 }
  0xaa   :  { %v126_v7 = vrot.slane %v78_v60, %v125_v51 }
  0xab   :  { %v147_v11 = vsel %vm127_vm3, %v146_v62, %v142_v3 }
  0xac   :  { %v128_v16 = vsel %vm127_vm3, %v126_v7, %v121_v10 }
  0xad   :  { %v149_v17 = vsel %vm148_vm4, %v147_v11, %v128_v16 }
  0xae   :  { %425 = vmatmul.mubr.msk.f32.vlgmr.msra.gmra.mxu0 %vm150_vm5, %v149_v17 }
 0x16e   :  { %v219_v24 = vpop.f32.mrf.mxu0 }
 0x16f   :  { %v220_v25 = vadd.f32 %v403_v23, %v219_v24 }
 0x170   :  { %v426_v26 = vpop.f32.mrf.mxu0 }
 0x171   :  { %v223_v27 = vmax.f32 %v220_v25, 0.0 }
 0x173   :  { %430 = vmatmul.mubr.msk.f32.vlgmr.msra.gmra.mxu1 %vm232_vm7, %v223_v27 }
 0x233   :  { %v306_v29 = vpop.f32.mrf.mxu1 }
 0x234   :  { %v307_v30 = vadd.f32 %v405_v28, %v306_v29 }
 0x235   :  { %v431_v31 = vpop.f32.mrf.mxu1 }
 0x236   :  { %v408_v32 = vmul.f32 -1.442695, %v307_v30 }
 0x238   :  { %438 = vpow2.f32 %v408_v32 }
 0x245   :  { %v439_v33 = vpop.eup %438 }
 0x246   :  { %v313_v34 = vadd.f32 1.0, %v439_v33 }
 0x248   :  { %440 = vrcp.f32 %v313_v34 }
 0x255   :  { %v441_v37 = vpop.eup %440 }
 0x256   :  { %v319_v38 = vrot.slane %v441_v37, %v318_v35  ;;  %v338_v40 = vrot.slane %v441_v37, %v337_v39 }
 0x258   :  { %325 = vbcast.lane.b32.xlu1 %v319_v38, 264  ;;  %321 = vbcast.lane.b32.xlu0 %v319_v38, 256 }
 0x25c   :  { %329 = vbcast.lane.b32.xlu1 %v319_v38, 272  ;;  %340 = vbcast.lane.b32.xlu0 %v338_v40, 256 }
 0x260   :  { %333 = vbcast.lane.b32.xlu1 %v319_v38, 280  ;;  %348 = vbcast.lane.b32.xlu0 %v338_v40, 272 }
 0x264   :  { %344 = vbcast.lane.b32.xlu1 %v338_v40, 264 }
 0x268   :  { %352 = vbcast.lane.b32.xlu1 %v338_v40, 280 }
 0x2ca   :  { %v326_v41 = vpop.permute.xlu1 %325  ;;  %v322_v42 = vpop.permute.xlu0 %321 }
 0x2cb   :  { %v356_v43 = vmul.f32 %v326_v41, %v544_v8  ;;  %v357_v44 = vmul.f32 %v326_v41, %v546_v9  ;;  %v354_v45 = vmul.f32 %v322_v42, %v532_v2  ;;  %v355_v46 = vmul.f32 %v322_v42, %v536_v4 }
 0x2cd   :  { %372 = vst [vmem:[#allocation5 + $0x10] sm:$0xff] %v356_v43  ;;  %373 = vst [vmem:[#allocation5 + $0x18] sm:$0xff] %v357_v44 }
 0x2ce   :  { %370 = vst [vmem:[#allocation5] sm:$0xff] %v354_v45  ;;  %371 = vst [vmem:[#allocation5 + $0x8] sm:$0xff] %v355_v46  ;;  %v330_v36 = vpop.permute.xlu1 %329  ;;  %v341_v47 = vpop.permute.xlu0 %340 }
 0x2cf   :  { %v358_v48 = vmul.f32 %v330_v36, %v556_v14  ;;  %v359_v49 = vmul.f32 %v330_v36, %v558_v15  ;;  %v362_v50 = vmul.f32 %v341_v47, %v528_v0  ;;  %v363_v8 = vmul.f32 %v341_v47, %v530_v1 }
 0x2d1   :  { %374 = vst [vmem:[#allocation5 + $0x20] sm:$0xff] %v358_v48  ;;  %375 = vst [vmem:[#allocation5 + $0x28] sm:$0xff] %v359_v49 }
 0x2d2   :  { %378 = vst [vmem:[#allocation5 + $0x40] sm:$0xff] %v362_v50  ;;  %379 = vst [vmem:[#allocation5 + $0x48] sm:$0xff] %v363_v8  ;;  %v334_v2 = vpop.permute.xlu1 %333  ;;  %v349_v4 = vpop.permute.xlu0 %348 }
 0x2d3   :  { %v360_v9 = vmul.f32 %v334_v2, %v568_v20  ;;  %v361_v51 = vmul.f32 %v334_v2, %v570_v21  ;;  %v366_v52 = vmul.f32 %v349_v4, %v552_v12  ;;  %v367_v14 = vmul.f32 %v349_v4, %v554_v13 }
 0x2d5   :  { %376 = vst [vmem:[#allocation5 + $0x30] sm:$0xff] %v360_v9  ;;  %377 = vst [vmem:[#allocation5 + $0x38] sm:$0xff] %v361_v51 }
 0x2d6   :  { %382 = vst [vmem:[#allocation5 + $0x60] sm:$0xff] %v366_v52  ;;  %383 = vst [vmem:[#allocation5 + $0x68] sm:$0xff] %v367_v14  ;;  %v345_v0 = vpop.permute.xlu1 %344 }
 0x2d7   :  { %v364_v1 = vmul.f32 %v345_v0, %v538_v5  ;;  %v365_v15 = vmul.f32 %v345_v0, %v540_v6 }
 0x2d9   :  { %380 = vst [vmem:[#allocation5 + $0x50] sm:$0xff] %v364_v1  ;;  %381 = vst [vmem:[#allocation5 + $0x58] sm:$0xff] %v365_v15 }
 0x2da   :  { %v353_v20 = vpop.permute.xlu1 %352 }
 0x2db   :  { %v368_v21 = vmul.f32 %v353_v20, %v564_v18  ;;  %v369_v12 = vmul.f32 %v353_v20, %v566_v19 }
 0x2dd   :  { %384 = vst [vmem:[#allocation5 + $0x70] sm:$0xff] %v368_v21  ;;  %385 = vst [vmem:[#allocation5 + $0x78] sm:$0xff] %v369_v12 }
 0x2de   :  { %473 = shalt.err (!%p470_p9)
}
 0x2df   :  { %397 = dma.vmem_to_hbm [thread:$0]  %s392_s3, 2048, %s632_s5, [#allocation4], %s487_s21, %s487_s21, %s488_s22  }
 0x2e0   :  { %484 = dma.done.wait [#allocation4], 2048  }
 0x2e1   :  { %485 = vsyncadd [#allocation4], 4294965248 }
 0x2e2   :  { %401 = vsyncpa [#allocation3], 1 }
 0x2e3   :  { %402 = vsyncpa [#allocation4], 1 }

</bundles_post_ra>
